<compile_context>
chip_gen: v6e
topology: v6e:2x2x1
jax: 0.10.0
libtpu: 0.0.40
codegen_flags: <defaults>
</compile_context>

<pallas_src>
import jax
import jax.numpy as jnp
from jax.experimental import pallas as pl
from jax.experimental.pallas import tpu as pltpu


def outconv_kernel(x_ref, w_ref, b_ref, o_ref):
    # x_ref: (1, C_in, T_S)   w_ref: (C_out, C_in)
    # b_ref: (C_out, 1)       o_ref: (1, C_out, T_S)
    # 1x1x1 conv per voxel:  out[:, s] = W @ x[:, s] + b
    acc = jnp.dot(w_ref[...], x_ref[0], preferred_element_type=jnp.float32)
    o_ref[0] = (acc + b_ref[...].astype(jnp.float32)).astype(o_ref.dtype)


def _pick_spatial_tile(s_total, target=32768):
    """Lane-dense spatial tile: full extent if small, else a multiple of 128."""
    if s_total <= target:
        return s_total                     # equals full array dim -> always legal
    return (target // 128) * 128           # ragged last tile handled by Pallas masking


def out_conv_1x1x1(x_ncdhw, weight, bias, *, spatial_tile=32768):
    """PyTorch OutConv forward: nn.Conv3d(C_in, C_out, kernel_size=1).

    x_ncdhw: (N, C_in, D, H, W)
    weight : (C_out, C_in, 1, 1, 1)   (PyTorch Conv3d layout)
    bias   : (C_out,)
    returns: (N, C_out, D, H, W)
    """
    N, C_in, D, H, W = x_ncdhw.shape
    C_out = weight.shape[0]
    S = D * H * W

    # Free, contiguous reshapes only -- no extra HBM traffic in the wrapper.
    x3 = x_ncdhw.reshape(N, C_in, S)
    w2d = weight.reshape(C_out, C_in)
    b2d = bias.reshape(C_out, 1)

    t_s = _pick_spatial_tile(S, spatial_tile)
    n_s = pl.cdiv(S, t_s)

    out3 = pl.pallas_call(
        outconv_kernel,
        out_shape=jax.ShapeDtypeStruct((N, C_out, S), x_ncdhw.dtype),
        grid_spec=pltpu.PrefetchScalarGridSpec(
            num_scalar_prefetch=0,
            grid=(N, n_s),
            in_specs=[
                pl.BlockSpec((1, C_in, t_s), lambda n, s: (n, 0, s)),
                pl.BlockSpec((C_out, C_in), lambda n, s: (0, 0)),
                pl.BlockSpec((C_out, 1), lambda n, s: (0, 0)),
            ],
            out_specs=pl.BlockSpec((1, C_out, t_s), lambda n, s: (n, 0, s)),
        ),
        compiler_params=pltpu.CompilerParams(
            # Both grid axes are independent -> megacore sharding on v7x.
            dimension_semantics=("parallel", "parallel"),
            # Explicit scoped-VMEM budget; safe on v5e/v6e (128 MiB) and v7x (64 MiB),
            # and far above this kernel's few-MiB lane-dense footprint.
            vmem_limit_bytes=32 * 1024 * 1024,
        ),
    )(x3, w2d, b2d)

    return out3.reshape(N, C_out, D, H, W)


if __name__ == "__main__":
    key = jax.random.PRNGKey(0)
    N, C_in, C_out = 2, 4, 3
    D = H = W = 8

    kx, kw, kb = jax.random.split(key, 3)
    x = jax.random.normal(kx, (N, C_in, D, H, W), dtype=jnp.float32)
    # Conv3d weight layout: (C_out, C_in, 1, 1, 1)
    weight = jax.random.normal(kw, (C_out, C_in, 1, 1, 1), dtype=jnp.float32) * 0.1
    bias = jax.random.normal(kb, (C_out,), dtype=jnp.float32) * 0.1

    y = out_conv_1x1x1(x, weight, bias)
    y = jax.block_until_ready(y)

    # Reference: plain-JAX 1x1x1 conv.
    ref = jnp.einsum("ncdhw,oc->nodhw", x, weight.reshape(C_out, C_in)) + \
        bias.reshape(1, C_out, 1, 1, 1)
    assert y.shape == (N, C_out, D, H, W)
    assert jnp.allclose(y, ref, atol=1e-5, rtol=1e-5)

    print("KERNEL_OK")
</pallas_src>

<mosaic_0001>
module attributes {stable_mosaic.version = 11 : i64} {
  func.func @outconv_kernel(%arg0: i32, %arg1: i32, %arg2: memref<1x4x512xf32, #tpu.memory_space<vmem>>, %arg3: memref<3x4xf32, #tpu.memory_space<vmem>>, %arg4: memref<3x1xf32, #tpu.memory_space<vmem>>, %arg5: memref<1x3x512xf32, #tpu.memory_space<vmem>>) attributes {dimension_semantics = [#tpu.dimension_semantics<parallel>, #tpu.dimension_semantics<parallel>], iteration_bounds = array<i64: 2, 1>, scalar_prefetch = 0 : i64, scratch_operands = 0 : i64, tpu.core_type = #tpu.core_type<tc>, window_params = [{transform_indices = @transform_0, window_bounds = array<i64: 1, 4, 512>}, {pipeline_mode = #tpu.pipeline_mode<synchronous>, transform_indices = @transform_1, window_bounds = array<i64: 3, 4>}, {pipeline_mode = #tpu.pipeline_mode<synchronous>, transform_indices = @transform_2, window_bounds = array<i64: 3, 1>}, {transform_indices = @transform_3, window_bounds = array<i64: 1, 3, 512>}]} {
    %c0 = arith.constant 0 : index
    %c0_0 = arith.constant 0 : index
    %0 = vector.load %arg3[%c0, %c0_0] : memref<3x4xf32, #tpu.memory_space<vmem>>, vector<3x4xf32>
    %c0_1 = arith.constant 0 : index
    %c0_2 = arith.constant 0 : index
    %c0_3 = arith.constant 0 : index
    %1 = vector.load %arg2[%c0_1, %c0_2, %c0_3] : memref<1x4x512xf32, #tpu.memory_space<vmem>>, vector<1x4x512xf32>
    %2 = vector.shape_cast %1 : vector<1x4x512xf32> to vector<4x512xf32>
    %cst = arith.constant dense<0.000000e+00> : vector<3x512xf32>
    %3 = tpu.matmul %0, %2, %cst {dimension_numbers = #tpu.dot_dimension_numbers<[1], [0], [0], [1], [0, 0, 1, 1], [], []>} : vector<3x4xf32>, vector<4x512xf32>, vector<3x512xf32> -> vector<3x512xf32>
    %c0_4 = arith.constant 0 : index
    %c0_5 = arith.constant 0 : index
    %4 = vector.load %arg4[%c0_4, %c0_5] : memref<3x1xf32, #tpu.memory_space<vmem>>, vector<3x1xf32>
    %5 = vector.broadcast %4 : vector<3x1xf32> to vector<3x512xf32>
    %6 = arith.addf %3, %5 : vector<3x512xf32>
    %c0_6 = arith.constant 0 : index
    %c0_7 = arith.constant 0 : index
    %c0_8 = arith.constant 0 : index
    %7 = vector.load %arg5[%c0_6, %c0_7, %c0_8] : memref<1x3x512xf32, #tpu.memory_space<vmem>>, vector<1x3x512xf32>
    %8 = vector.shape_cast %7 : vector<1x3x512xf32> to vector<3x512xf32>
    %9 = vector.shape_cast %6 : vector<3x512xf32> to vector<1x3x512xf32>
    tpu.vector_store %arg5[%c0_6, %c0_7, %c0_8], %9 {strides = array<i32>} : memref<1x3x512xf32, #tpu.memory_space<vmem>>, vector<1x3x512xf32>,
    return
  }
  func.func @transform_0(%arg0: i32, %arg1: i32) -> (i32, i32, i32) {
    %c0_i32 = arith.constant 0 : i32
    %c0_i32_0 = arith.constant 0 : i32
    return %arg0, %c0_i32, %arg1 : i32, i32, i32
  }
  func.func @transform_1(%arg0: i32, %arg1: i32) -> (i32, i32) {
    %c0_i32 = arith.constant 0 : i32
    %c0_i32_0 = arith.constant 0 : i32
    %c0_i32_1 = arith.constant 0 : i32
    return %c0_i32, %c0_i32_0 : i32, i32
  }
  func.func @transform_2(%arg0: i32, %arg1: i32) -> (i32, i32) {
    %c0_i32 = arith.constant 0 : i32
    %c0_i32_0 = arith.constant 0 : i32
    %c0_i32_1 = arith.constant 0 : i32
    return %c0_i32, %c0_i32_0 : i32, i32
  }
  func.func @transform_3(%arg0: i32, %arg1: i32) -> (i32, i32, i32) {
    %c0_i32 = arith.constant 0 : i32
    %c0_i32_0 = arith.constant 0 : i32
    return %arg0, %c0_i32, %arg1 : i32, i32, i32
  }
}

</mosaic_0001>

<bundles_post_ra>
// kernel: tpu_custom_call.1
= control target key start
LH: loop header
LB: loop body
LE: loop exit
PB: predicated region body
PF: predicated region fallthrough
CT: control target
= control target key end

     0   :  { %8 = vsyncpa [#allocation3], 0  ;;  %s780_s0 = inlined_call_operand.hbm [shape: f32[2,4,512], index: 0, kind: input, shape index: {}]   ;;  %s781_s1 = inlined_call_operand.vmem [shape: f32[3,4], index: 1, kind: input, shape index: {}]   ;;  %s782_s2 = inlined_call_operand.vmem [shape: f32[3,1], index: 2, kind: input, shape index: {}]   ;;  %s783_s3 = inlined_call_operand.vmem [shape: f32[2,3,512], index: 3, kind: output, shape index: {}]  }
   0x1   :  { %10 = vsyncpa [#allocation3 + $0x1], 0  ;;  %s674_s12 = smov 0   ;;  %s676_s13 = smov 0  }
   0x2   :  { %s678_s14 = smov 0   ;;  %s680_s15 = smov 0  }
   0x3   :  { %s682_s16 = smov 0   ;;  %s684_s17 = smov 0  }
   0x4 LB: > { %s490_s18 = sadd.s32 4294967295, %s649_s17   ;;  %s28_s19 = sadd.s32 1, %s645_s16  ;;  %s649_s17 = sphi %s684_s17, %s16_s17   ;;  %s645_s16 = sphi %s682_s16, %s791_s16   ;;  %s641_s15 = sphi %s680_s15, %s790_s15   ;;  %s637_s14 = sphi %s678_s14, %s789_s14   ;;  %s633_s13 = sphi %s676_s13, %s788_s13   ;;  %s629_s12 = sphi %s674_s12, %s787_s12  }
   0x5   : > { %p30_p0 = scmp.ge.s32.totalorder %s28_s19, 2  ;;  %s37_s20 = sadd.s32 1, %s637_s14 }
   0x6   : > { %p44_p1 = scmp.ne.s32.totalorder %s637_s14, %s633_s13  ;;  %p45_p2 = scmp.eq.s32.totalorder %s649_s17, 0 }
   0x7   : > { %s793_s19 = smov (%p30_p0, %s28_s19), 0  ;;  %p50_p4 = scmp.ne.s32.totalorder %s633_s13, %s629_s12 }
   0x8   : > { %p710_p3 = por %p45_p2, %p44_p1  ;;  %s32_s22 = ssub.s32 %s645_s16, %s793_s19 }
   0x9   : > { %p51_p5 = scmp.eq.s32.totalorder %s490_s18, 0  ;;  %p35_p6 = scmp.eq.s32.totalorder %s32_s22, 0 }
   0xa   : > { %p517_p8 = scmp.lt.s32.totalorder %s649_s17, 2  ;;  %s150_s25 = sand.u32 1, %s637_s14  }
   0xb   : > { %p717_p7 = por %p51_p5, %p50_p4  ;;  %s509_s26 = sshll.u32 %s645_s16, 8 }
   0xc   : > { %s723_s24 = scalar_select %p35_p6, %s637_s14, %s37_s20  }
   0xd   : > { %s494_s27 = sshll.u32 %s150_s25, 4  ;;  %s162_s30 = scalar_lea.hbm %s780_s0, %s509_s26 }
   0xe   : > { %s154_s4 = scalar_lea.vmem [#allocation2], %s494_s27  ;;  %p732_p9 = pnand %p517_p8, %p710_p3 }
   0xf   : > { %s164_s5 = sshll.u32 %s154_s4, 4  ;;  %p497_p10 = scmp.ge.s32.totalorder %s649_s17, 1  ;;  %s165_s5 = int_to_ptr.vmem [resolvable:$true] %s164_s5 }
  0x10   : > { %p169_p11 = scmp.lt.s32.totalorder %s649_s17, 3  ;;  %s151_s7 = scalar_lea.sflag [#allocation3], %s150_s25 }
  0x11   : > { %p573_p12 = pneg %p732_p9  ;;  %s584_s8 = scalar_lea.vmem %s165_s5, 256 }
  0x12   : > { %p585_p13 = scmp.ne.s32.totalorder %s165_s5, %s584_s8  ;;  %s651_s9 = smov [#allocation2]  }
  0x13   : > { %s589_s10 = sshll.u32 %s651_s9, 4  ;;  %s590_s10 = int_to_ptr.vmem [resolvable:$false] %s589_s10 }
  0x14   : > { %p587_p0 = pnand %p585_p13, %p573_p12  ;;  %s591_s11 = scalar_lea.vmem %s590_s10, 512 }
  0x15   : > { %p592_p2 = scmp.lt.s32.totalorder %s165_s5, %s590_s10  ;;  %p593_p3 = scmp.lt.s32.totalorder %s591_s11, %s584_s8 }
  0x16   : > { %p588_p1 = pneg %p587_p0 }
  0x17   : > { %p594_p4 = por %p593_p3, %p592_p2 }
  0x19   : > { %p595_p5 = pnand %p594_p4, %p588_p1 }
  0x1b   : > { %598 = shalt.err (!%p595_p5)
}
  0x1c   : > { %516 = dma.hbm_to_vmem [thread:$0]  (!%p732_p9), %s162_s30, 256, %s165_s5, %s151_s7  }
  0x1d   : > { %p170_p6 = pnand %p497_p10, %p169_p11 }
  0x1e   : > { %s175_s12 = sand.u32 (!%p170_p6), 1, %s633_s13  }
  0x1f   : > { %173 = sbr.rel (%p170_p6) target bundleno = 243 (0xf3), region = 32  ;;  %s498_s18 = sshll.u32 (!%p170_p6), %s175_s12, 4 }
  0x20   : > { %s176_s20 = scalar_lea.sflag (!%p170_p6), [#allocation3], %s175_s12  ;;  %s179_s21 = scalar_lea.vmem (!%p170_p6), [#allocation2], %s498_s18 }
  0x24   : > { %624 = dma.done.wait (%p717_p7), %s176_s20, 256  }
  0x25   : > { %626 = vsyncadd (%p717_p7), %s176_s20, 4294967040  ;;  %v652_v0 = vmov 0.0   ;;  %v653_v1 = vmov 0   ;;  %v218_v2 = vld [vmem:[%s179_s21] sm:$0xff]  ;;  %vm234_vm0 = vcmask 1043456   ;;  %v219_v3 = vld [vmem:[%s179_s21 + $0x8] sm:$0xff] }
  0x26   : > { %307 = vmatprep.mubr.f32.mxu0 %v652_v0  ;;  %378 = vmatprep.mubr.f32.mxu1 %v652_v0  ;;  %v228_v4 = vcombine.high %v218_v2, %v218_v2  ;;  %v229_v5 = vcombine.high %v219_v3, %v219_v3  ;;  %v220_v6 = vld [vmem:[%s782_s2] sm:$0x7]  ;;  %vm230_vm1 = vcmask 31744   ;;  %p208_p7 = scmp.lt.s32.totalorder %s641_s15, 1 }
  0x27   : > { %568 = vset.pattern.permute.xlu0 %v653_v1  ;;  %v217_v7 = vld [vmem:[%s781_s1] sm:$0x7] }
  0x28   : > { %223 = vperm.xlu0 %568, %v220_v6   ;;  %501 = vmatprep.subr.msk.mxu0 %vm234_vm0, %v228_v4  ;;  %s795_s15 = smov (!%p208_p7, %s641_s15), 1 }
  0x29   : > { %504 = vmatprep.subr.msk.mxu1 %vm234_vm0, %v229_v5  ;;  %502 = vmatpush1.msk.msra.mxu0 %vm234_vm0, %v218_v2  ;;  %s510_s23 = sshll.u32 %s795_s15, 4 }
  0x2a   : > { %505 = vmatpush1.msk.msra.mxu1 %vm234_vm0, %v219_v3  ;;  %503 = vmatmul.mubr.msk.f32.vlgmr.msra.gmra.mxu0 %vm230_vm1, %v217_v7  ;;  %s215_s30 = scalar_lea.vmem %s783_s3, %s510_s23 }
  0x2b   : > { %506 = vmatmul.mubr.msk.f32.vlgmr.msra.gmra.mxu1 %vm230_vm1, %v217_v7 }
  0xa3   : > { %v224_v8 = vpop.permute.xlu0 %223 }
  0xea   : > { %v309_v9 = vpop.f32.mrf.mxu0 }
  0xeb   : > { %v380_v10 = vpop.f32.mrf.mxu1  ;;  %v310_v13 = vadd.f32 %v309_v9, %v224_v8 }
  0xec   : > { %v311_v11 = vpop.f32.mrf.mxu0  ;;  %v381_v14 = vadd.f32 %v380_v10, %v224_v8 }
  0xed   : > { %v382_v12 = vpop.f32.mrf.mxu1  ;;  %v312_v15 = vadd.f32 %v311_v11, %v224_v8 }
  0xee   : > { %v383_v16 = vadd.f32 %v382_v12, %v224_v8 }
  0xef   : > { %v389_v17 = vcombine.low %v310_v13, %v312_v15 }
  0xf0   : > { %v390_v18 = vcombine.low %v381_v14, %v383_v16 }
  0xf1   : > { %393 = vst [vmem:[%s215_s30] sm:$0x77] %v389_v17 }
  0xf2   : > { %394 = vst [vmem:[%s215_s30 + $0x8] sm:$0x77] %v390_v18 }
  0xf3 PF: > { %s16_s17 = sadd.s32 1, %s649_s17   ;;  %s787_s12 = smov %s633_s13 }
  0xf4   : > { %p13_p8 = scmp.ge.s32.totalorder %s16_s17, 4   ;;  %s788_s13 = smov %s637_s14 }
  0xf5   : > { %s789_s14 = smov %s723_s24  ;;  %s790_s15 = smov %s645_s16 }
  0xf6   : > { %s791_s16 = smov %s793_s19  ;;  %15 = sbr.rel (!%p13_p8) target bundleno = 4 (0x4), region = 72 }
  0xfb   :  { %425 = vsyncpa [#allocation3], 1 }
  0xfc   :  { %427 = vsyncpa [#allocation3 + $0x1], 1 }

</bundles_post_ra>
